<compile_context>
chip_gen: v5e
topology: v5e:2x2
jax: 0.10.0
libtpu: 0.0.40
codegen_flags: <defaults>
</compile_context>

<pallas_src>
import functools

import jax
import jax.numpy as jnp
from jax import lax
from jax.experimental import pallas as pl
from jax.experimental.pallas import tpu as pltpu


def _kd_loss_kernel(x_ref, t_ref, o_ref, *, temp_factor: float, batch: int, tile_b: int):
    inv_t = 1.0 / temp_factor
    x = x_ref[...].astype(jnp.float32) * inv_t          # student logits / T
    t = t_ref[...].astype(jnp.float32) * inv_t          # teacher logits / T

    # Shifted logits (numerically stable; reused for the exps and for log q - log p).
    x_sh = x - jnp.max(x, axis=1, keepdims=True)
    t_sh = t - jnp.max(t, axis=1, keepdims=True)

    e_x = jnp.exp(x_sh)
    e_t = jnp.exp(t_sh)
    sum_x = jnp.sum(e_x, axis=1, keepdims=True)          # (tile_b, 1)
    sum_t = jnp.sum(e_t, axis=1, keepdims=True)          # (tile_b, 1)

    # Fused tail:
    #   KL_row = sum_c q_c * ((t_sh - x_sh)_c + (lse_x - lse_t))
    #          = (sum_c e_t_c * (t_sh - x_sh)_c) / sum_t + (log sum_x - log sum_t)
    # Only one extra full-size mul+sub; everything else is (tile_b, 1).
    s = jnp.sum(e_t * (t_sh - x_sh), axis=1, keepdims=True)      # (tile_b, 1)
    inv_sum_t = 1.0 / sum_t                                      # exact; tiny tensor
    row_kl = s * inv_sum_t + (jnp.log(sum_x) - jnp.log(sum_t))   # (tile_b, 1)

    # Row-level remainder masking: zero padded rows' partials before the scalar sum so
    # any NaN/Inf from uninitialized out-of-bounds rows cannot propagate.
    if batch % tile_b != 0:
        rows = pl.program_id(0) * tile_b + lax.broadcasted_iota(
            jnp.int32, (tile_b, 1), 0)
        row_kl = jnp.where(rows < batch, row_kl, 0.0)

    partial = jnp.sum(row_kl)                                    # scalar partial KL sum

    # Lane-dense, unmasked store of the per-tile partial; wrapper reads [:, 0, 0].
    o_ref[...] = jnp.full(o_ref.shape, partial, dtype=jnp.float32)


def _sublane_multiple(dtype) -> int:
    itemsize = jnp.dtype(dtype).itemsize
    return {4: 8, 2: 16, 1: 32}.get(itemsize, 8)


def _round_up(x: int, m: int) -> int:
    return ((x + m - 1) // m) * m


def kd_loss(input_logits: jax.Array, target_logits: jax.Array, temp_factor: float) -> jax.Array:
    """Pallas implementation of KDLoss.forward(input, target). Returns a scalar."""
    assert input_logits.shape == target_logits.shape and input_logits.ndim == 2
    assert input_logits.dtype == target_logits.dtype
    B, C = input_logits.shape
    itemsize = jnp.dtype(input_logits.dtype).itemsize
    sublane = _sublane_multiple(input_logits.dtype)

    # Generation-aware VMEM budgets: v5e/v6e have 128 MiB VMEM, v7x only 64 MiB.
    vmem_capacity = 128 * 1024 * 1024
    try:
        info = pltpu.get_tpu_info()
        vmem_capacity = int(getattr(info, "vmem_capacity_bytes", vmem_capacity))
    except Exception:
        pass
    if vmem_capacity <= 64 * 1024 * 1024:
        # v7x: keep 2 inputs x 2 pipeline buffers + f32 working temporaries well under 64 MiB.
        target_block_bytes = 3 * 1024 * 1024
        vmem_limit_bytes = 48 * 1024 * 1024
    else:
        # v5e/v6e: bigger blocks push the DMA pipeline toward the HBM roofline and amortize
        # the ~0.35us per-grid-step overhead.
        target_block_bytes = 6 * 1024 * 1024
        vmem_limit_bytes = 96 * 1024 * 1024

    # Byte-based row selection (no fixed row cap): biggest sublane-multiple tile whose input
    # block stays within the per-block byte budget.
    row_bytes = max(1, C * itemsize)
    rows = max(sublane, (target_block_bytes // row_bytes) // sublane * sublane)

    if rows >= B:
        # Whole batch would fit in one block: still split into >=2 tiles (sublane-rounded
        # ceil(B/2)) so a 2-TensorCore chip (v7x) can shard the 'parallel' axis. For tiny B
        # this collapses back to a single tile; the extra grid step elsewhere is negligible.
        half = _round_up(max(1, pl.cdiv(B, 2)), sublane)
        tile_b = min(half, _round_up(B, sublane))
    else:
        tile_b = rows
    grid = pl.cdiv(B, tile_b)

    kernel = functools.partial(
        _kd_loss_kernel,
        temp_factor=float(temp_factor),
        batch=B,
        tile_b=tile_b,
    )

    cost = pl.CostEstimate(
        flops=10 * B * C,                     # scale/shift/exp-prep/mul/reduce per element
        transcendentals=2 * B * C,            # exp(x_sh) + exp(t_sh)
        bytes_accessed=2 * B * C * itemsize + grid * 8 * 128 * 4,
    )

    partials = pl.pallas_call(
        kernel,
        out_shape=jax.ShapeDtypeStruct((grid, 8, 128), jnp.float32),
        grid=(grid,),
        in_specs=[
            pl.BlockSpec((tile_b, C), lambda i: (i, 0)),
            pl.BlockSpec((tile_b, C), lambda i: (i, 0)),
        ],
        out_specs=pl.BlockSpec((1, 8, 128), lambda i: (i, 0, 0)),
        compiler_params=pltpu.CompilerParams(
            dimension_semantics=("parallel",),
            vmem_limit_bytes=vmem_limit_bytes,
        ),
        cost_estimate=cost,
    )(input_logits, target_logits)

    # Per-tile partial sums -> scalar; single scale by T^2 / true batch size.
    total = jnp.sum(partials[:, 0, 0])
    return total * (float(temp_factor) * float(temp_factor)) / B


if __name__ == "__main__":
    key = jax.random.PRNGKey(0)
    k1, k2 = jax.random.split(key)

    B, C = 8, 32          # small (batch, num_classes) logits
    temp_factor = 2.0

    x = jax.random.normal(k1, (B, C), dtype=jnp.float32)   # student logits
    t = jax.random.normal(k2, (B, C), dtype=jnp.float32)   # teacher logits

    loss = kd_loss(x, t, temp_factor)
    jax.block_until_ready(loss)

    # Pure-JAX reference check (same math as the PyTorch module).
    log_p = jax.nn.log_softmax(x / temp_factor, axis=1)
    q = jax.nn.softmax(t / temp_factor, axis=1)
    ref = jnp.sum(q * (jnp.log(q) - log_p)) * temp_factor ** 2 / B

    # Exact (non-approx) division is used in-kernel, so only f32 reduction-order noise remains.
    assert jnp.allclose(loss, ref, rtol=1e-4, atol=1e-5), (loss, ref)

    print("KERNEL_OK")
</pallas_src>

<mosaic_0001>
module attributes {stable_mosaic.version = 11 : i64} {
  func.func @_kd_loss_kernel(%arg0: i32, %arg1: memref<8x32xf32, #tpu.memory_space<vmem>>, %arg2: memref<8x32xf32, #tpu.memory_space<vmem>>, %arg3: memref<1x8x128xf32, #tpu.memory_space<vmem>>) attributes {dimension_semantics = [#tpu.dimension_semantics<parallel>], iteration_bounds = array<i64: 1>, scalar_prefetch = 0 : i64, scratch_operands = 0 : i64, tpu.core_type = #tpu.core_type<tc>, window_params = [{transform_indices = @transform_0, window_bounds = array<i64: 8, 32>}, {transform_indices = @transform_1, window_bounds = array<i64: 8, 32>}, {transform_indices = @transform_2, window_bounds = array<i64: 1, 8, 128>}]} {
    %c0 = arith.constant 0 : index
    %c0_0 = arith.constant 0 : index
    %0 = vector.load %arg1[%c0, %c0_0] : memref<8x32xf32, #tpu.memory_space<vmem>>, vector<8x32xf32>
    %cst = arith.constant 5.000000e-01 : f32
    %1 = vector.broadcast %cst : f32 to vector<8x32xf32>
    %2 = arith.mulf %0, %1 : vector<8x32xf32>
    %c0_1 = arith.constant 0 : index
    %c0_2 = arith.constant 0 : index
    %3 = vector.load %arg2[%c0_1, %c0_2] : memref<8x32xf32, #tpu.memory_space<vmem>>, vector<8x32xf32>
    %cst_3 = arith.constant 5.000000e-01 : f32
    %4 = vector.broadcast %cst_3 : f32 to vector<8x32xf32>
    %5 = arith.mulf %3, %4 : vector<8x32xf32>
    %cst_4 = arith.constant dense<0xFF800000> : vector<8xf32>
    %6 = vector.multi_reduction <maximumf>, %2, %cst_4 [1] : vector<8x32xf32> to vector<8xf32>
    %7 = vector.shape_cast %6 : vector<8xf32> to vector<8x1xf32>
    %8 = vector.broadcast %7 : vector<8x1xf32> to vector<8x32xf32>
    %9 = arith.subf %2, %8 : vector<8x32xf32>
    %cst_5 = arith.constant dense<0xFF800000> : vector<8xf32>
    %10 = vector.multi_reduction <maximumf>, %5, %cst_5 [1] : vector<8x32xf32> to vector<8xf32>
    %11 = vector.shape_cast %10 : vector<8xf32> to vector<8x1xf32>
    %12 = vector.broadcast %11 : vector<8x1xf32> to vector<8x32xf32>
    %13 = arith.subf %5, %12 : vector<8x32xf32>
    %14 = math.exp %9 : vector<8x32xf32>
    %15 = math.exp %13 : vector<8x32xf32>
    %cst_6 = arith.constant dense<0.000000e+00> : vector<8xf32>
    %16 = vector.multi_reduction <add>, %14, %cst_6 [1] : vector<8x32xf32> to vector<8xf32>
    %17 = vector.shape_cast %16 : vector<8xf32> to vector<8x1xf32>
    %cst_7 = arith.constant dense<0.000000e+00> : vector<8xf32>
    %18 = vector.multi_reduction <add>, %15, %cst_7 [1] : vector<8x32xf32> to vector<8xf32>
    %19 = vector.shape_cast %18 : vector<8xf32> to vector<8x1xf32>
    %20 = arith.subf %13, %9 : vector<8x32xf32>
    %21 = arith.mulf %15, %20 : vector<8x32xf32>
    %cst_8 = arith.constant dense<0.000000e+00> : vector<8xf32>
    %22 = vector.multi_reduction <add>, %21, %cst_8 [1] : vector<8x32xf32> to vector<8xf32>
    %23 = vector.shape_cast %22 : vector<8xf32> to vector<8x1xf32>
    %cst_9 = arith.constant 1.000000e+00 : f32
    %24 = vector.broadcast %cst_9 : f32 to vector<8x1xf32>
    %25 = arith.divf %24, %19 : vector<8x1xf32>
    %26 = arith.mulf %23, %25 : vector<8x1xf32>
    %27 = math.log %17 : vector<8x1xf32>
    %28 = math.log %19 : vector<8x1xf32>
    %29 = arith.subf %27, %28 : vector<8x1xf32>
    %30 = arith.addf %26, %29 : vector<8x1xf32>
    %31 = vector.shape_cast %30 : vector<8x1xf32> to vector<1x8x1xf32>
    %cst_10 = arith.constant dense<0.000000e+00> : vector<1xf32>
    %32 = vector.multi_reduction <add>, %31, %cst_10 [1, 2] : vector<1x8x1xf32> to vector<1xf32>
    %33 = vector.shape_cast %32 : vector<1xf32> to vector<1x1x1xf32>
    %34 = vector.extract %33[0, 0, 0] : f32 from vector<1x1x1xf32>
    %35 = vector.broadcast %34 : f32 to vector<1x8x128xf32>
    %c0_11 = arith.constant 0 : index
    %c0_12 = arith.constant 0 : index
    %c0_13 = arith.constant 0 : index
    %36 = vector.load %arg3[%c0_11, %c0_12, %c0_13] : memref<1x8x128xf32, #tpu.memory_space<vmem>>, vector<1x8x128xf32>
    tpu.vector_store %arg3[%c0_11, %c0_12, %c0_13], %35 {strides = array<i32>} : memref<1x8x128xf32, #tpu.memory_space<vmem>>, vector<1x8x128xf32>,
    return
  }
  func.func @transform_0(%arg0: i32) -> (i32, i32) {
    %c0_i32 = arith.constant 0 : i32
    %c0_i32_0 = arith.constant 0 : i32
    return %arg0, %c0_i32 : i32, i32
  }
  func.func @transform_1(%arg0: i32) -> (i32, i32) {
    %c0_i32 = arith.constant 0 : i32
    %c0_i32_0 = arith.constant 0 : i32
    return %arg0, %c0_i32 : i32, i32
  }
  func.func @transform_2(%arg0: i32) -> (i32, i32, i32) {
    %c0_i32 = arith.constant 0 : i32
    %c0_i32_0 = arith.constant 0 : i32
    %c0_i32_1 = arith.constant 0 : i32
    return %arg0, %c0_i32, %c0_i32_0 : i32, i32, i32
  }
}

</mosaic_0001>

<bundles_post_ra>
// kernel: tpu_custom_call.1
= control target key start
LH: loop header
LB: loop body
LE: loop exit
PB: predicated region body
PF: predicated region fallthrough
CT: control target
= control target key end

     0   :  { %7 = vsyncpa [#allocation3], 0  ;;  %s246_s0 = inlined_call_operand.hbm [shape: f32[8,32], index: 0, kind: input, shape index: {}]   ;;  %s247_s1 = inlined_call_operand.hbm [shape: f32[8,32], index: 1, kind: input, shape index: {}]   ;;  %s248_s2 = inlined_call_operand.hbm [shape: f32[1,8,128], index: 2, kind: output, shape index: {}]  }
   0x1   :  { %8 = vsyncpa [#allocation6], 0 }
   0x2   :  { %9 = vsyncpa [#allocation4], 0  ;;  %s15_s11 = sshll.u32 %s246_s0, 4  ;;  %s214_s12 = smov [#allocation2]   ;;  %s16_s11 = int_to_ptr.hbm [resolvable:$true] %s15_s11 }
   0x3   :  { %s17_s13 = sshll.u32 %s214_s12, 4  ;;  %s26_s16 = sshll.u32 %s247_s1, 4  ;;  %s18_s13 = int_to_ptr.vmem [resolvable:$true] %s17_s13  ;;  %s27_s16 = int_to_ptr.hbm [resolvable:$true] %s26_s16 }
   0x4   :  { %20 = dma.hbm_to_vmem [thread:$0]  %s16_s11, 128, %s18_s13, [#allocation3]  }
   0x5   :  { %s215_s17 = smov [#allocation5]  }
   0x6   :  { %s28_s18 = sshll.u32 %s215_s17, 4  ;;  %s29_s18 = int_to_ptr.vmem [resolvable:$true] %s28_s18 }
   0x7   :  { %31 = dma.hbm_to_vmem [thread:$0]  %s27_s16, 128, %s29_s18, [#allocation6]  }
   0x8   :  { %208 = dma.done.wait [#allocation3], 128  }
   0x9   :  { %209 = vsyncadd [#allocation3], 4294967168 }
   0xa   :  { %210 = dma.done.wait [#allocation6], 128  }
   0xb   :  { %211 = vsyncadd [#allocation6], 4294967168  ;;  %v42_v0 = vld [vmem:[#allocation5] sm:$0xff]  ;;  %vm44_vm0 = vcmask 261120   ;;  %v40_v2 = vld [vmem:[#allocation2] sm:$0xff]  ;;  %vm90_vm5 = vcmask 7168  }
   0xc   :  { %v43_v1 = vmul.f32 0.5, %v42_v0  ;;  %v41_v4 = vmul.f32 0.5, %v40_v2  ;;  %s216_s0 = smov [#allocation7]   ;;  %s110_s21 = sshll.u32 %s248_s2, 4  ;;  %s111_s21 = int_to_ptr.hbm [resolvable:$true] %s110_s21 }
   0xd   :  { %s108_s1 = sshll.u32 %s216_s0, 4  ;;  %s109_s1 = int_to_ptr.vmem [resolvable:$true] %s108_s1 }
   0xe   :  { %v49_v3 = vsel %vm44_vm0, %v43_v1, -inf  ;;  %v45_v5 = vsel %vm44_vm0, %v41_v4, -inf }
   0xf   :  { %50 = vmax.xlane.f32.xlu0 %v49_v3 }
  0x17   :  { %46 = vmax.xlane.f32.xlu0 %v45_v5 }
  0x82   :  { %v51_v6 = vpop.xlane.xlu0 %50 }
  0x83   :  { %v52_v7 = vsub.f32 %v43_v1, %v51_v6 }
  0x85   :  { %v55_v8 = vmul.f32 1.442695, %v52_v7 }
  0x87   :  { %126 = vpow2.f32 %v55_v8 }
  0x8a   :  { %v47_v9 = vpop.xlane.xlu0 %46 }
  0x8b   :  { %v48_v10 = vsub.f32 %v41_v4, %v47_v9 }
  0x8d   :  { %v127_v11 = vpop.eup %126  ;;  %v53_v12 = vmul.f32 1.442695, %v48_v10  ;;  %v63_v13 = vsub.f32 %v52_v7, %v48_v10 }
  0x8e   :  { %v60_v14 = vsel %vm44_vm0, %v127_v11, 0.0 }
  0x8f   :  { %128 = vpow2.f32 %v53_v12  ;;  %61 = vadd.xlane.f32.xlu1 %v60_v14  ;;  %v64_v15 = vmul.f32 %v127_v11, %v63_v13 }
  0x91   :  { %v65_v16 = vsel %vm44_vm0, %v64_v15, 0.0 }
  0x92   :  { %66 = vadd.xlane.f32.xlu2 %v65_v16 }
  0x95   :  { %v129_v17 = vpop.eup %128 }
  0x96   :  { %v57_v18 = vsel %vm44_vm0, %v129_v17, 0.0 }
  0x97   :  { %58 = vadd.xlane.f32.xlu1 %v57_v18 }
 0x102   :  { %v62_v19 = vpop.xlane.xlu1 %61 }
 0x103   :  { %130 = vrcp.f32 %v62_v19  ;;  %v79_v24 = vand.u32 2147483648, %v62_v19  ;;  %v77_v26 = vand.u32 2147483647, %v62_v19  ;;  %vm73_vm2 = vweird.f32 %v62_v19 }
 0x104   :  { %132 = vlog2.f32 %v62_v19 }
 0x105   :  { %v80_v30 = vor.u32 1.1754944e-38, %v79_v24  ;;  %vm78_vm4 = vcmp.eq.f32.partialorder %v77_v26, 8.507059e+37  ;;  %v67_v35 = vpop.xlane.xlu2 %66 }
 0x109   :  { %v131_v20 = vpop.eup %130 }
 0x10a   :  { %v69_v21 = vmul.f32 %v131_v20, %v62_v19  ;;  %v59_v22 = vpop.xlane.xlu1 %58  ;;  %vm74_vm1 = vweird.f32 %v131_v20  ;;  %v133_v27 = vpop.eup %132 }
 0x10b   :  { %134 = vlog2.f32 %v59_v22  ;;  %vm75_vm3 = vmor %vm73_vm2, %vm74_vm1  ;;  %v87_v32 = vmul.f32 0.6931472, %v133_v27 }
 0x10c   :  { %v70_v23 = vsub.f32 1.0, %v69_v21 }
 0x10e   :  { %v71_v25 = vmul.f32 %v131_v20, %v70_v23 }
 0x110   :  { %v72_v28 = vadd.f32 %v131_v20, %v71_v25 }
 0x111   :  { %v135_v29 = vpop.eup %134 }
 0x112   :  { %v76_v31 = vsel %vm75_vm3, %v131_v20, %v72_v28  ;;  %v85_v33 = vmul.f32 0.6931472, %v135_v29 }
 0x113   :  { %v81_v34 = vsel %vm78_vm4, %v80_v30, %v76_v31 }
 0x114   :  { %v83_v36 = vmul.f32 %v81_v34, %v67_v35  ;;  %v88_v37 = vsub.f32 %v85_v33, %v87_v32 }
 0x116   :  { %v89_v38 = vadd.f32 %v88_v37, %v83_v36 }
 0x118   :  { %v91_v39 = vsel %vm90_vm5, %v89_v38, 0.0 }
 0x119   :  { %92 = vadd.xlane.f32.xlu2 %v91_v39 }
 0x18c   :  { %v93_v40 = vpop.xlane.xlu2 %92 }
 0x18d   :  { %v94_v41 = vrot.slane %v93_v40, 4 }
 0x18f   :  { %v95_v42 = vadd.f32 %v94_v41, %v93_v40 }
 0x191   :  { %v96_v43 = vrot.slane %v95_v42, 2 }
 0x193   :  { %v97_v44 = vadd.f32 %v96_v43, %v95_v42 }
 0x195   :  { %v98_v45 = vrot.slane %v97_v44, 1 }
 0x197   :  { %v99_v46 = vadd.f32 %v98_v45, %v97_v44 }
 0x199   :  { %121 = vpush %v99_v46 }
 0x1ca   :  { %s122_s22 = spop %121 }
 0x1cb   :  { %v101_v47 = vstv %s122_s22 }
 0x1cc   :  { %102 = vst [vmem:[#allocation7] sm:$0xff] %v101_v47 }
 0x1cd   :  { %113 = dma.vmem_to_hbm [thread:$0]  %s109_s1, 128, %s111_s21, [#allocation4]  }
 0x1ce   :  { %212 = dma.done.wait [#allocation4], 128  }
 0x1cf   :  { %213 = vsyncadd [#allocation4], 4294967168 }
 0x1d0   :  { %118 = vsyncpa [#allocation3], 1 }
 0x1d1   :  { %119 = vsyncpa [#allocation6], 1 }
 0x1d2   :  { %120 = vsyncpa [#allocation4], 1 }

</bundles_post_ra>
